<compile_context>
chip_gen: v5e
topology: v5e:2x2
jax: 0.10.0
libtpu: 0.0.40
codegen_flags: <defaults>
</compile_context>

<pallas_src>
import functools

import jax
import jax.numpy as jnp
from jax.experimental import pallas as pl
from jax.experimental.pallas import tpu as pltpu

_BIG_NEG = jnp.float32(-1e30)   # stands in for MaxPool2d's implicit -inf padding
_TAPS = (-2, -1, 1, 2)          # non-center taps of the 5-wide window


def _sppf_kernel(x_ref, w1_ref, b1_ref, w2_ref, b2_ref, mw_ref, mh_ref, o_ref,
                 *, width):
    """One batch element: x_ref block (1, C1, HW) -> o_ref block (1, C2, HW)."""
    x = x_ref[0]             # (C1, HW)   native dtype (f32 or bf16)
    w1 = w1_ref[...]         # (C_, C1)   BN-folded cv1 weight (param dtype)
    b1 = b1_ref[...]         # (C_, 1)    BN-folded cv1 bias (f32)
    w2 = w2_ref[...]         # (4, C2, C_) BN-folded cv2 weight, split by group
    b2 = b2_ref[...]         # (C2, 1)    f32
    mw = mw_ref[...]         # (4, 1, HW) additive edge masks for the W taps (f32)
    mh = mh_ref[...]         # (4, 1, HW) additive edge masks for the H taps (f32)
    hw = x.shape[-1]
    mm_dtype = w2_ref.dtype  # dtype fed to the cv2 MXU matmuls

    # ---- cv1: 1x1 conv (+ folded BN) + SiLU; MXU accumulates in f32 --------
    t = jnp.dot(w1, x, preferred_element_type=jnp.float32) + b1      # (C_, HW) f32
    t = t * jax.nn.sigmoid(t)                                         # SiLU (f32 VPU/EUP)

    # ---- 5x5 / stride 1 / pad 2 max pool, separable (W taps, then H taps) --
    def pool5(z):
        m = z                                      # center tap is always valid
        for j, d in enumerate(_TAPS):              # along W: flat shift by d
            m = jnp.maximum(m, pltpu.roll(z, (-d) % hw, axis=1) + mw[j])
        out = m
        for j, d in enumerate(_TAPS):              # along H: flat shift by d*W
            out = jnp.maximum(out, pltpu.roll(m, (-d * width) % hw, axis=1) + mh[j])
        return out

    # ---- cv2 partial matmuls interleaved with the pool chain ---------------
    # cv2(cat([t, y1, y2, y3])) == sum_k dot(w2[k], y_k); interleaving keeps the
    # live f32 working set small and overlaps MXU work with the pool's XLU/VPU work.
    acc = jnp.dot(w2[0], t.astype(mm_dtype), preferred_element_type=jnp.float32)
    y = pool5(t)                                                       # y1
    acc = acc + jnp.dot(w2[1], y.astype(mm_dtype), preferred_element_type=jnp.float32)
    y = pool5(y)                                                       # y2
    acc = acc + jnp.dot(w2[2], y.astype(mm_dtype), preferred_element_type=jnp.float32)
    y = pool5(y)                                                       # y3
    acc = acc + jnp.dot(w2[3], y.astype(mm_dtype), preferred_element_type=jnp.float32)
    acc = acc + b2                                                     # (C2, HW) f32
    o = acc * jax.nn.sigmoid(acc)                                      # SiLU
    o_ref[0] = o.astype(o_ref.dtype)                                   # direct store


def _fold_bn(w, gamma, beta, mean, var, eps=1e-3):
    """Fold eval-mode BatchNorm into a bias-free 1x1 conv weight (computed in f32)."""
    cout, cin = w.shape[0], w.shape[1]
    scale = gamma.astype(jnp.float32) / jnp.sqrt(var.astype(jnp.float32) + eps)
    wf = (w.reshape(cout, cin).astype(jnp.float32) * scale[:, None])        # (Cout, Cin)
    bf = (beta.astype(jnp.float32) - scale * mean.astype(jnp.float32))      # (Cout,)
    return wf, bf.reshape(cout, 1)


def _pool_masks(h, w):
    """Additive (-1e30 at out-of-range taps, else 0) masks for the flat HW axis."""
    hw = h * w
    idx = jnp.arange(hw, dtype=jnp.int32)
    wpos = idx % w
    hpos = idx // w
    mw = jnp.stack([jnp.where((wpos + d >= 0) & (wpos + d < w), 0.0, _BIG_NEG)
                    for d in _TAPS]).reshape(len(_TAPS), 1, hw).astype(jnp.float32)
    mh = jnp.stack([jnp.where((hpos + d >= 0) & (hpos + d < h), 0.0, _BIG_NEG)
                    for d in _TAPS]).reshape(len(_TAPS), 1, hw).astype(jnp.float32)
    return mw, mh


def sppf(x, w1, g1, be1, rm1, rv1, w2, g2, be2, rm2, rv2, *,
         param_dtype=None, out_dtype=None):
    """SPPF forward.

    x: (B, C1, H, W) NCHW, f32 or bf16 (streamed in its native dtype).
    w1: (C1//2, C1, 1, 1), w2: (C2, 4*(C1//2), 1, 1)  -- PyTorch Conv2d weights.
    g*/be*/rm*/rv*: BatchNorm2d gamma/beta/running_mean/running_var (eps=1e-3).
    param_dtype: dtype the folded conv weights are streamed/matmul'd in
                 (default: x.dtype).  out_dtype: output dtype (default: x.dtype).
    Returns (B, C2, H, W) matching SPPF.forward in eval mode.
    """
    B, C1, H, W = x.shape
    Cm = C1 // 2
    C2 = w2.shape[0]
    HW = H * W
    param_dtype = x.dtype if param_dtype is None else jnp.dtype(param_dtype)
    out_dtype = x.dtype if out_dtype is None else jnp.dtype(out_dtype)

    w1f, b1f = _fold_bn(w1, g1, be1, rm1, rv1)            # (Cm, C1), (Cm, 1)  f32
    w2f, b2f = _fold_bn(w2, g2, be2, rm2, rv2)            # (C2, 4*Cm), (C2, 1) f32
    # Split cv2's weight by the 4 concatenated input groups -> (4, C2, Cm),
    # so cv2 is a sum of 4 matmuls (no in-kernel channel concatenation).
    w2s = jnp.stack([w2f[:, k * Cm:(k + 1) * Cm] for k in range(4)], axis=0)
    w1f = w1f.astype(param_dtype)                         # bf16 weights for bf16 models
    w2s = w2s.astype(param_dtype)
    mw, mh = _pool_masks(H, W)

    # Contiguous reshape is free; NO dtype cast -> x streams HBM->VMEM in native dtype.
    x3 = x.reshape(B, C1, HW)

    # Explicit VMEM budget (generous upper bound), clamped to [32 MiB, 64 MiB]
    # so it stays inside v7x's 64 MiB physical VMEM while raising the default
    # scoped limit on v5e/v6e for production shapes.
    xi = jnp.dtype(x.dtype).itemsize
    pi = jnp.dtype(param_dtype).itemsize
    oi = jnp.dtype(out_dtype).itemsize
    est = (2 * C1 * HW * xi                       # double-buffered x block
           + 2 * C2 * HW * oi                     # double-buffered out block
           + 2 * (Cm * C1 + 4 * C2 * Cm) * pi     # weight blocks (2 pipeline buffers)
           + 2 * (Cm + C2) * 4                    # bias blocks
           + 2 * 8 * HW * 4                       # mask blocks
           + (3 * Cm * HW + C2 * HW) * 4)         # live f32 planes (t/y/tmp + acc)
    vmem_limit = int(max(32 << 20, min(int(est * 1.5), 64 << 20)))

    kernel = functools.partial(_sppf_kernel, width=W)
    out = pl.pallas_call(
        kernel,
        out_shape=jax.ShapeDtypeStruct((B, C2, HW), out_dtype),
        grid_spec=pltpu.PrefetchScalarGridSpec(
            num_scalar_prefetch=0,
            grid=(B,),
            in_specs=[
                pl.BlockSpec((1, C1, HW), lambda b: (b, 0, 0)),   # x (streamed)
                pl.BlockSpec((Cm, C1), lambda b: (0, 0)),          # cv1 weight (grid-invariant)
                pl.BlockSpec((Cm, 1), lambda b: (0, 0)),           # cv1 bias
                pl.BlockSpec((4, C2, Cm), lambda b: (0, 0, 0)),    # cv2 weight (split)
                pl.BlockSpec((C2, 1), lambda b: (0, 0)),           # cv2 bias
                pl.BlockSpec((4, 1, HW), lambda b: (0, 0, 0)),     # W-tap masks
                pl.BlockSpec((4, 1, HW), lambda b: (0, 0, 0)),     # H-tap masks
            ],
            out_specs=pl.BlockSpec((1, C2, HW), lambda b: (b, 0, 0)),
        ),
        compiler_params=pltpu.CompilerParams(
            dimension_semantics=("parallel",),     # megacore: shard batch on v7x
            vmem_limit_bytes=vmem_limit),
    )(x3, w1f, b1f, w2s, b2f, mw, mh)

    return out.reshape(B, C2, H, W)


def sppf_reference(x, w1, g1, be1, rm1, rv1, w2, g2, be2, rm2, rv2, eps=1e-3):
    """Pure-JAX reference mirroring the PyTorch SPPF module (eval mode), f32."""
    def conv_bn_silu(z, w, gamma, beta, mean, var):
        cout, cin = w.shape[0], w.shape[1]
        y = jnp.einsum('bchw,oc->bohw', z, w.reshape(cout, cin))
        scale = gamma / jnp.sqrt(var + eps)
        y = y * scale[None, :, None, None] + (beta - scale * mean)[None, :, None, None]
        return y * jax.nn.sigmoid(y)

    def maxpool5(z):
        return jax.lax.reduce_window(
            z, -jnp.inf, jax.lax.max,
            window_dimensions=(1, 1, 5, 5), window_strides=(1, 1, 1, 1),
            padding=((0, 0), (0, 0), (2, 2), (2, 2)))

    t = conv_bn_silu(x, w1, g1, be1, rm1, rv1)
    y1 = maxpool5(t)
    y2 = maxpool5(y1)
    y3 = maxpool5(y2)
    cat = jnp.concatenate([t, y1, y2, y3], axis=1)
    return conv_bn_silu(cat, w2, g2, be2, rm2, rv2)


if __name__ == "__main__":
    B, C1, C2, H, W = 2, 16, 16, 16, 16
    Cm = C1 // 2

    key = jax.random.PRNGKey(0)
    ks = jax.random.split(key, 12)
    x = jax.random.normal(ks[0], (B, C1, H, W), dtype=jnp.float32)

    # cv1: Conv(C1 -> Cm) + BN(Cm)
    w1 = 0.2 * jax.random.normal(ks[1], (Cm, C1, 1, 1), dtype=jnp.float32)
    g1 = 1.0 + 0.1 * jax.random.normal(ks[2], (Cm,), dtype=jnp.float32)
    be1 = 0.1 * jax.random.normal(ks[3], (Cm,), dtype=jnp.float32)
    rm1 = 0.1 * jax.random.normal(ks[4], (Cm,), dtype=jnp.float32)
    rv1 = jnp.abs(jax.random.normal(ks[5], (Cm,), dtype=jnp.float32)) + 0.5

    # cv2: Conv(4*Cm -> C2) + BN(C2)
    w2 = 0.2 * jax.random.normal(ks[6], (C2, 4 * Cm, 1, 1), dtype=jnp.float32)
    g2 = 1.0 + 0.1 * jax.random.normal(ks[7], (C2,), dtype=jnp.float32)
    be2 = 0.1 * jax.random.normal(ks[8], (C2,), dtype=jnp.float32)
    rm2 = 0.1 * jax.random.normal(ks[9], (C2,), dtype=jnp.float32)
    rv2 = jnp.abs(jax.random.normal(ks[10], (C2,), dtype=jnp.float32)) + 0.5

    ref = sppf_reference(x, w1, g1, be1, rm1, rv1, w2, g2, be2, rm2, rv2)

    # f32 path: exact-precision check against the pure-JAX reference.
    out = sppf(x, w1, g1, be1, rm1, rv1, w2, g2, be2, rm2, rv2)
    out = jax.block_until_ready(out)
    assert out.shape == (B, C2, H, W)
    err = float(jnp.max(jnp.abs(out - ref)))
    assert err < 1e-4, f"f32 max abs err {err}"

    # bf16 streaming path (production configuration): x, weights and output in bf16,
    # pool/SiLU math in f32.  Loose sanity bound (bf16 has ~3 significant digits).
    out_bf = sppf(x.astype(jnp.bfloat16), w1, g1, be1, rm1, rv1,
                  w2, g2, be2, rm2, rv2)
    out_bf = jax.block_until_ready(out_bf)
    assert out_bf.dtype == jnp.bfloat16 and out_bf.shape == (B, C2, H, W)
    err_bf = float(jnp.max(jnp.abs(out_bf.astype(jnp.float32) - ref)))
    assert err_bf < 1.0, f"bf16 max abs err {err_bf}"

    print("KERNEL_OK")
</pallas_src>

<mosaic_0001>
module attributes {stable_mosaic.version = 11 : i64} {
  func.func @_sppf_kernel(%arg0: i32, %arg1: memref<1x16x256xf32, #tpu.memory_space<vmem>>, %arg2: memref<8x16xf32, #tpu.memory_space<vmem>>, %arg3: memref<8x1xf32, #tpu.memory_space<vmem>>, %arg4: memref<4x16x8xf32, #tpu.memory_space<vmem>>, %arg5: memref<16x1xf32, #tpu.memory_space<vmem>>, %arg6: memref<4x1x256xf32, #tpu.memory_space<vmem>>, %arg7: memref<4x1x256xf32, #tpu.memory_space<vmem>>, %arg8: memref<1x16x256xf32, #tpu.memory_space<vmem>>) attributes {dimension_semantics = [#tpu.dimension_semantics<parallel>], iteration_bounds = array<i64: 2>, scalar_prefetch = 0 : i64, scratch_operands = 0 : i64, tpu.core_type = #tpu.core_type<tc>, window_params = [{transform_indices = @transform_0, window_bounds = array<i64: 1, 16, 256>}, {pipeline_mode = #tpu.pipeline_mode<synchronous>, transform_indices = @transform_1, window_bounds = array<i64: 8, 16>}, {pipeline_mode = #tpu.pipeline_mode<synchronous>, transform_indices = @transform_2, window_bounds = array<i64: 8, 1>}, {pipeline_mode = #tpu.pipeline_mode<synchronous>, transform_indices = @transform_3, window_bounds = array<i64: 4, 16, 8>}, {pipeline_mode = #tpu.pipeline_mode<synchronous>, transform_indices = @transform_4, window_bounds = array<i64: 16, 1>}, {pipeline_mode = #tpu.pipeline_mode<synchronous>, transform_indices = @transform_5, window_bounds = array<i64: 4, 1, 256>}, {pipeline_mode = #tpu.pipeline_mode<synchronous>, transform_indices = @transform_6, window_bounds = array<i64: 4, 1, 256>}, {transform_indices = @transform_7, window_bounds = array<i64: 1, 16, 256>}]} {
    %c0 = arith.constant 0 : index
    %c0_0 = arith.constant 0 : index
    %c0_1 = arith.constant 0 : index
    %0 = vector.load %arg1[%c0, %c0_0, %c0_1] : memref<1x16x256xf32, #tpu.memory_space<vmem>>, vector<1x16x256xf32>
    %1 = vector.shape_cast %0 : vector<1x16x256xf32> to vector<16x256xf32>
    %c0_2 = arith.constant 0 : index
    %c0_3 = arith.constant 0 : index
    %2 = vector.load %arg2[%c0_2, %c0_3] : memref<8x16xf32, #tpu.memory_space<vmem>>, vector<8x16xf32>
    %c0_4 = arith.constant 0 : index
    %c0_5 = arith.constant 0 : index
    %3 = vector.load %arg3[%c0_4, %c0_5] : memref<8x1xf32, #tpu.memory_space<vmem>>, vector<8x1xf32>
    %c0_6 = arith.constant 0 : index
    %c0_7 = arith.constant 0 : index
    %c0_8 = arith.constant 0 : index
    %4 = vector.load %arg4[%c0_6, %c0_7, %c0_8] : memref<4x16x8xf32, #tpu.memory_space<vmem>>, vector<4x16x8xf32>
    %c0_9 = arith.constant 0 : index
    %c0_10 = arith.constant 0 : index
    %5 = vector.load %arg5[%c0_9, %c0_10] : memref<16x1xf32, #tpu.memory_space<vmem>>, vector<16x1xf32>
    %c0_11 = arith.constant 0 : index
    %c0_12 = arith.constant 0 : index
    %c0_13 = arith.constant 0 : index
    %6 = vector.load %arg6[%c0_11, %c0_12, %c0_13] : memref<4x1x256xf32, #tpu.memory_space<vmem>>, vector<4x1x256xf32>
    %c0_14 = arith.constant 0 : index
    %c0_15 = arith.constant 0 : index
    %c0_16 = arith.constant 0 : index
    %7 = vector.load %arg7[%c0_14, %c0_15, %c0_16] : memref<4x1x256xf32, #tpu.memory_space<vmem>>, vector<4x1x256xf32>
    %cst = arith.constant dense<0.000000e+00> : vector<8x256xf32>
    %8 = tpu.matmul %2, %1, %cst {dimension_numbers = #tpu.dot_dimension_numbers<[1], [0], [0], [1], [0, 0, 1, 1], [], []>} : vector<8x16xf32>, vector<16x256xf32>, vector<8x256xf32> -> vector<8x256xf32>
    %9 = vector.broadcast %3 : vector<8x1xf32> to vector<8x256xf32>
    %10 = arith.addf %8, %9 : vector<8x256xf32>
    %11 = arith.negf %10 : vector<8x256xf32>
    %12 = math.exp %11 : vector<8x256xf32>
    %cst_17 = arith.constant 1.000000e+00 : f32
    %13 = vector.broadcast %cst_17 : f32 to vector<8x256xf32>
    %14 = arith.addf %13, %12 : vector<8x256xf32>
    %15 = arith.divf %13, %14 : vector<8x256xf32>
    %16 = arith.mulf %10, %15 : vector<8x256xf32>
    %17 = vector.extract_strided_slice %4 {offsets = [0, 0, 0], sizes = [1, 16, 8], strides = [1, 1, 1]} : vector<4x16x8xf32> to vector<1x16x8xf32>
    %18 = vector.shape_cast %17 : vector<1x16x8xf32> to vector<16x8xf32>
    %cst_18 = arith.constant dense<0.000000e+00> : vector<16x256xf32>
    %19 = tpu.matmul %18, %16, %cst_18 {dimension_numbers = #tpu.dot_dimension_numbers<[1], [0], [0], [1], [0, 0, 1, 1], [], []>} : vector<16x8xf32>, vector<8x256xf32>, vector<16x256xf32> -> vector<16x256xf32>
    %c2_i32 = arith.constant 2 : i32
    %20 = tpu.dynamic_rotate %16 by %c2_i32 dim 1 : vector<8x256xf32>, i32 -> vector<8x256xf32>
    %21 = vector.extract_strided_slice %6 {offsets = [0, 0, 0], sizes = [1, 1, 256], strides = [1, 1, 1]} : vector<4x1x256xf32> to vector<1x1x256xf32>
    %22 = vector.shape_cast %21 : vector<1x1x256xf32> to vector<1x256xf32>
    %23 = vector.broadcast %22 : vector<1x256xf32> to vector<8x256xf32>
    %24 = arith.addf %20, %23 : vector<8x256xf32>
    %25 = arith.maximumf %16, %24 : vector<8x256xf32>
    %c1_i32 = arith.constant 1 : i32
    %26 = tpu.dynamic_rotate %16 by %c1_i32 dim 1 : vector<8x256xf32>, i32 -> vector<8x256xf32>
    %27 = vector.extract_strided_slice %6 {offsets = [1, 0, 0], sizes = [1, 1, 256], strides = [1, 1, 1]} : vector<4x1x256xf32> to vector<1x1x256xf32>
    %28 = vector.shape_cast %27 : vector<1x1x256xf32> to vector<1x256xf32>
    %29 = vector.broadcast %28 : vector<1x256xf32> to vector<8x256xf32>
    %30 = arith.addf %26, %29 : vector<8x256xf32>
    %31 = arith.maximumf %25, %30 : vector<8x256xf32>
    %c255_i32 = arith.constant 255 : i32
    %32 = tpu.dynamic_rotate %16 by %c255_i32 dim 1 : vector<8x256xf32>, i32 -> vector<8x256xf32>
    %33 = vector.extract_strided_slice %6 {offsets = [2, 0, 0], sizes = [1, 1, 256], strides = [1, 1, 1]} : vector<4x1x256xf32> to vector<1x1x256xf32>
    %34 = vector.shape_cast %33 : vector<1x1x256xf32> to vector<1x256xf32>
    %35 = vector.broadcast %34 : vector<1x256xf32> to vector<8x256xf32>
    %36 = arith.addf %32, %35 : vector<8x256xf32>
    %37 = arith.maximumf %31, %36 : vector<8x256xf32>
    %c254_i32 = arith.constant 254 : i32
    %38 = tpu.dynamic_rotate %16 by %c254_i32 dim 1 : vector<8x256xf32>, i32 -> vector<8x256xf32>
    %39 = vector.extract_strided_slice %6 {offsets = [3, 0, 0], sizes = [1, 1, 256], strides = [1, 1, 1]} : vector<4x1x256xf32> to vector<1x1x256xf32>
    %40 = vector.shape_cast %39 : vector<1x1x256xf32> to vector<1x256xf32>
    %41 = vector.broadcast %40 : vector<1x256xf32> to vector<8x256xf32>
    %42 = arith.addf %38, %41 : vector<8x256xf32>
    %43 = arith.maximumf %37, %42 : vector<8x256xf32>
    %c32_i32 = arith.constant 32 : i32
    %44 = tpu.dynamic_rotate %43 by %c32_i32 dim 1 : vector<8x256xf32>, i32 -> vector<8x256xf32>
    %45 = vector.extract_strided_slice %7 {offsets = [0, 0, 0], sizes = [1, 1, 256], strides = [1, 1, 1]} : vector<4x1x256xf32> to vector<1x1x256xf32>
    %46 = vector.shape_cast %45 : vector<1x1x256xf32> to vector<1x256xf32>
    %47 = vector.broadcast %46 : vector<1x256xf32> to vector<8x256xf32>
    %48 = arith.addf %44, %47 : vector<8x256xf32>
    %49 = arith.maximumf %43, %48 : vector<8x256xf32>
    %c16_i32 = arith.constant 16 : i32
    %50 = tpu.dynamic_rotate %43 by %c16_i32 dim 1 : vector<8x256xf32>, i32 -> vector<8x256xf32>
    %51 = vector.extract_strided_slice %7 {offsets = [1, 0, 0], sizes = [1, 1, 256], strides = [1, 1, 1]} : vector<4x1x256xf32> to vector<1x1x256xf32>
    %52 = vector.shape_cast %51 : vector<1x1x256xf32> to vector<1x256xf32>
    %53 = vector.broadcast %52 : vector<1x256xf32> to vector<8x256xf32>
    %54 = arith.addf %50, %53 : vector<8x256xf32>
    %55 = arith.maximumf %49, %54 : vector<8x256xf32>
    %c240_i32 = arith.constant 240 : i32
    %56 = tpu.dynamic_rotate %43 by %c240_i32 dim 1 : vector<8x256xf32>, i32 -> vector<8x256xf32>
    %57 = vector.extract_strided_slice %7 {offsets = [2, 0, 0], sizes = [1, 1, 256], strides = [1, 1, 1]} : vector<4x1x256xf32> to vector<1x1x256xf32>
    %58 = vector.shape_cast %57 : vector<1x1x256xf32> to vector<1x256xf32>
    %59 = vector.broadcast %58 : vector<1x256xf32> to vector<8x256xf32>
    %60 = arith.addf %56, %59 : vector<8x256xf32>
    %61 = arith.maximumf %55, %60 : vector<8x256xf32>
    %c224_i32 = arith.constant 224 : i32
    %62 = tpu.dynamic_rotate %43 by %c224_i32 dim 1 : vector<8x256xf32>, i32 -> vector<8x256xf32>
    %63 = vector.extract_strided_slice %7 {offsets = [3, 0, 0], sizes = [1, 1, 256], strides = [1, 1, 1]} : vector<4x1x256xf32> to vector<1x1x256xf32>
    %64 = vector.shape_cast %63 : vector<1x1x256xf32> to vector<1x256xf32>
    %65 = vector.broadcast %64 : vector<1x256xf32> to vector<8x256xf32>
    %66 = arith.addf %62, %65 : vector<8x256xf32>
    %67 = arith.maximumf %61, %66 : vector<8x256xf32>
    %68 = vector.extract_strided_slice %4 {offsets = [1, 0, 0], sizes = [1, 16, 8], strides = [1, 1, 1]} : vector<4x16x8xf32> to vector<1x16x8xf32>
    %69 = vector.shape_cast %68 : vector<1x16x8xf32> to vector<16x8xf32>
    %cst_19 = arith.constant dense<0.000000e+00> : vector<16x256xf32>
    %70 = tpu.matmul %69, %67, %cst_19 {dimension_numbers = #tpu.dot_dimension_numbers<[1], [0], [0], [1], [0, 0, 1, 1], [], []>} : vector<16x8xf32>, vector<8x256xf32>, vector<16x256xf32> -> vector<16x256xf32>
    %71 = arith.addf %19, %70 : vector<16x256xf32>
    %c2_i32_20 = arith.constant 2 : i32
    %72 = tpu.dynamic_rotate %67 by %c2_i32_20 dim 1 : vector<8x256xf32>, i32 -> vector<8x256xf32>
    %73 = vector.extract_strided_slice %6 {offsets = [0, 0, 0], sizes = [1, 1, 256], strides = [1, 1, 1]} : vector<4x1x256xf32> to vector<1x1x256xf32>
    %74 = vector.shape_cast %73 : vector<1x1x256xf32> to vector<1x256xf32>
    %75 = vector.broadcast %74 : vector<1x256xf32> to vector<8x256xf32>
    %76 = arith.addf %72, %75 : vector<8x256xf32>
    %77 = arith.maximumf %67, %76 : vector<8x256xf32>
    %c1_i32_21 = arith.constant 1 : i32
    %78 = tpu.dynamic_rotate %67 by %c1_i32_21 dim 1 : vector<8x256xf32>, i32 -> vector<8x256xf32>
    %79 = vector.extract_strided_slice %6 {offsets = [1, 0, 0], sizes = [1, 1, 256], strides = [1, 1, 1]} : vector<4x1x256xf32> to vector<1x1x256xf32>
    %80 = vector.shape_cast %79 : vector<1x1x256xf32> to vector<1x256xf32>
    %81 = vector.broadcast %80 : vector<1x256xf32> to vector<8x256xf32>
    %82 = arith.addf %78, %81 : vector<8x256xf32>
    %83 = arith.maximumf %77, %82 : vector<8x256xf32>
    %c255_i32_22 = arith.constant 255 : i32
    %84 = tpu.dynamic_rotate %67 by %c255_i32_22 dim 1 : vector<8x256xf32>, i32 -> vector<8x256xf32>
    %85 = vector.extract_strided_slice %6 {offsets = [2, 0, 0], sizes = [1, 1, 256], strides = [1, 1, 1]} : vector<4x1x256xf32> to vector<1x1x256xf32>
    %86 = vector.shape_cast %85 : vector<1x1x256xf32> to vector<1x256xf32>
    %87 = vector.broadcast %86 : vector<1x256xf32> to vector<8x256xf32>
    %88 = arith.addf %84, %87 : vector<8x256xf32>
    %89 = arith.maximumf %83, %88 : vector<8x256xf32>
    %c254_i32_23 = arith.constant 254 : i32
    %90 = tpu.dynamic_rotate %67 by %c254_i32_23 dim 1 : vector<8x256xf32>, i32 -> vector<8x256xf32>
    %91 = vector.extract_strided_slice %6 {offsets = [3, 0, 0], sizes = [1, 1, 256], strides = [1, 1, 1]} : vector<4x1x256xf32> to vector<1x1x256xf32>
    %92 = vector.shape_cast %91 : vector<1x1x256xf32> to vector<1x256xf32>
    %93 = vector.broadcast %92 : vector<1x256xf32> to vector<8x256xf32>
    %94 = arith.addf %90, %93 : vector<8x256xf32>
    %95 = arith.maximumf %89, %94 : vector<8x256xf32>
    %c32_i32_24 = arith.constant 32 : i32
    %96 = tpu.dynamic_rotate %95 by %c32_i32_24 dim 1 : vector<8x256xf32>, i32 -> vector<8x256xf32>
    %97 = vector.extract_strided_slice %7 {offsets = [0, 0, 0], sizes = [1, 1, 256], strides = [1, 1, 1]} : vector<4x1x256xf32> to vector<1x1x256xf32>
    %98 = vector.shape_cast %97 : vector<1x1x256xf32> to vector<1x256xf32>
    %99 = vector.broadcast %98 : vector<1x256xf32> to vector<8x256xf32>
    %100 = arith.addf %96, %99 : vector<8x256xf32>
    %101 = arith.maximumf %95, %100 : vector<8x256xf32>
    %c16_i32_25 = arith.constant 16 : i32
    %102 = tpu.dynamic_rotate %95 by %c16_i32_25 dim 1 : vector<8x256xf32>, i32 -> vector<8x256xf32>
    %103 = vector.extract_strided_slice %7 {offsets = [1, 0, 0], sizes = [1, 1, 256], strides = [1, 1, 1]} : vector<4x1x256xf32> to vector<1x1x256xf32>
    %104 = vector.shape_cast %103 : vector<1x1x256xf32> to vector<1x256xf32>
    %105 = vector.broadcast %104 : vector<1x256xf32> to vector<8x256xf32>
    %106 = arith.addf %102, %105 : vector<8x256xf32>
    %107 = arith.maximumf %101, %106 : vector<8x256xf32>
    %c240_i32_26 = arith.constant 240 : i32
    %108 = tpu.dynamic_rotate %95 by %c240_i32_26 dim 1 : vector<8x256xf32>, i32 -> vector<8x256xf32>
    %109 = vector.extract_strided_slice %7 {offsets = [2, 0, 0], sizes = [1, 1, 256], strides = [1, 1, 1]} : vector<4x1x256xf32> to vector<1x1x256xf32>
    %110 = vector.shape_cast %109 : vector<1x1x256xf32> to vector<1x256xf32>
    %111 = vector.broadcast %110 : vector<1x256xf32> to vector<8x256xf32>
    %112 = arith.addf %108, %111 : vector<8x256xf32>
    %113 = arith.maximumf %107, %112 : vector<8x256xf32>
    %c224_i32_27 = arith.constant 224 : i32
    %114 = tpu.dynamic_rotate %95 by %c224_i32_27 dim 1 : vector<8x256xf32>, i32 -> vector<8x256xf32>
    %115 = vector.extract_strided_slice %7 {offsets = [3, 0, 0], sizes = [1, 1, 256], strides = [1, 1, 1]} : vector<4x1x256xf32> to vector<1x1x256xf32>
    %116 = vector.shape_cast %115 : vector<1x1x256xf32> to vector<1x256xf32>
    %117 = vector.broadcast %116 : vector<1x256xf32> to vector<8x256xf32>
    %118 = arith.addf %114, %117 : vector<8x256xf32>
    %119 = arith.maximumf %113, %118 : vector<8x256xf32>
    %120 = vector.extract_strided_slice %4 {offsets = [2, 0, 0], sizes = [1, 16, 8], strides = [1, 1, 1]} : vector<4x16x8xf32> to vector<1x16x8xf32>
    %121 = vector.shape_cast %120 : vector<1x16x8xf32> to vector<16x8xf32>
    %cst_28 = arith.constant dense<0.000000e+00> : vector<16x256xf32>
    %122 = tpu.matmul %121, %119, %cst_28 {dimension_numbers = #tpu.dot_dimension_numbers<[1], [0], [0], [1], [0, 0, 1, 1], [], []>} : vector<16x8xf32>, vector<8x256xf32>, vector<16x256xf32> -> vector<16x256xf32>
    %123 = arith.addf %71, %122 : vector<16x256xf32>
    %c2_i32_29 = arith.constant 2 : i32
    %124 = tpu.dynamic_rotate %119 by %c2_i32_29 dim 1 : vector<8x256xf32>, i32 -> vector<8x256xf32>
    %125 = vector.extract_strided_slice %6 {offsets = [0, 0, 0], sizes = [1, 1, 256], strides = [1, 1, 1]} : vector<4x1x256xf32> to vector<1x1x256xf32>
    %126 = vector.shape_cast %125 : vector<1x1x256xf32> to vector<1x256xf32>
    %127 = vector.broadcast %126 : vector<1x256xf32> to vector<8x256xf32>
    %128 = arith.addf %124, %127 : vector<8x256xf32>
    %129 = arith.maximumf %119, %128 : vector<8x256xf32>
    %c1_i32_30 = arith.constant 1 : i32
    %130 = tpu.dynamic_rotate %119 by %c1_i32_30 dim 1 : vector<8x256xf32>, i32 -> vector<8x256xf32>
    %131 = vector.extract_strided_slice %6 {offsets = [1, 0, 0], sizes = [1, 1, 256], strides = [1, 1, 1]} : vector<4x1x256xf32> to vector<1x1x256xf32>
    %132 = vector.shape_cast %131 : vector<1x1x256xf32> to vector<1x256xf32>
    %133 = vector.broadcast %132 : vector<1x256xf32> to vector<8x256xf32>
    %134 = arith.addf %130, %133 : vector<8x256xf32>
    %135 = arith.maximumf %129, %134 : vector<8x256xf32>
    %c255_i32_31 = arith.constant 255 : i32
    %136 = tpu.dynamic_rotate %119 by %c255_i32_31 dim 1 : vector<8x256xf32>, i32 -> vector<8x256xf32>
    %137 = vector.extract_strided_slice %6 {offsets = [2, 0, 0], sizes = [1, 1, 256], strides = [1, 1, 1]} : vector<4x1x256xf32> to vector<1x1x256xf32>
    %138 = vector.shape_cast %137 : vector<1x1x256xf32> to vector<1x256xf32>
    %139 = vector.broadcast %138 : vector<1x256xf32> to vector<8x256xf32>
    %140 = arith.addf %136, %139 : vector<8x256xf32>
    %141 = arith.maximumf %135, %140 : vector<8x256xf32>
    %c254_i32_32 = arith.constant 254 : i32
    %142 = tpu.dynamic_rotate %119 by %c254_i32_32 dim 1 : vector<8x256xf32>, i32 -> vector<8x256xf32>
    %143 = vector.extract_strided_slice %6 {offsets = [3, 0, 0], sizes = [1, 1, 256], strides = [1, 1, 1]} : vector<4x1x256xf32> to vector<1x1x256xf32>
    %144 = vector.shape_cast %143 : vector<1x1x256xf32> to vector<1x256xf32>
    %145 = vector.broadcast %144 : vector<1x256xf32> to vector<8x256xf32>
    %146 = arith.addf %142, %145 : vector<8x256xf32>
    %147 = arith.maximumf %141, %146 : vector<8x256xf32>
    %c32_i32_33 = arith.constant 32 : i32
    %148 = tpu.dynamic_rotate %147 by %c32_i32_33 dim 1 : vector<8x256xf32>, i32 -> vector<8x256xf32>
    %149 = vector.extract_strided_slice %7 {offsets = [0, 0, 0], sizes = [1, 1, 256], strides = [1, 1, 1]} : vector<4x1x256xf32> to vector<1x1x256xf32>
    %150 = vector.shape_cast %149 : vector<1x1x256xf32> to vector<1x256xf32>
    %151 = vector.broadcast %150 : vector<1x256xf32> to vector<8x256xf32>
    %152 = arith.addf %148, %151 : vector<8x256xf32>
    %153 = arith.maximumf %147, %152 : vector<8x256xf32>
    %c16_i32_34 = arith.constant 16 : i32
    %154 = tpu.dynamic_rotate %147 by %c16_i32_34 dim 1 : vector<8x256xf32>, i32 -> vector<8x256xf32>
    %155 = vector.extract_strided_slice %7 {offsets = [1, 0, 0], sizes = [1, 1, 256], strides = [1, 1, 1]} : vector<4x1x256xf32> to vector<1x1x256xf32>
    %156 = vector.shape_cast %155 : vector<1x1x256xf32> to vector<1x256xf32>
    %157 = vector.broadcast %156 : vector<1x256xf32> to vector<8x256xf32>
    %158 = arith.addf %154, %157 : vector<8x256xf32>
    %159 = arith.maximumf %153, %158 : vector<8x256xf32>
    %c240_i32_35 = arith.constant 240 : i32
    %160 = tpu.dynamic_rotate %147 by %c240_i32_35 dim 1 : vector<8x256xf32>, i32 -> vector<8x256xf32>
    %161 = vector.extract_strided_slice %7 {offsets = [2, 0, 0], sizes = [1, 1, 256], strides = [1, 1, 1]} : vector<4x1x256xf32> to vector<1x1x256xf32>
    %162 = vector.shape_cast %161 : vector<1x1x256xf32> to vector<1x256xf32>
    %163 = vector.broadcast %162 : vector<1x256xf32> to vector<8x256xf32>
    %164 = arith.addf %160, %163 : vector<8x256xf32>
    %165 = arith.maximumf %159, %164 : vector<8x256xf32>
    %c224_i32_36 = arith.constant 224 : i32
    %166 = tpu.dynamic_rotate %147 by %c224_i32_36 dim 1 : vector<8x256xf32>, i32 -> vector<8x256xf32>
    %167 = vector.extract_strided_slice %7 {offsets = [3, 0, 0], sizes = [1, 1, 256], strides = [1, 1, 1]} : vector<4x1x256xf32> to vector<1x1x256xf32>
    %168 = vector.shape_cast %167 : vector<1x1x256xf32> to vector<1x256xf32>
    %169 = vector.broadcast %168 : vector<1x256xf32> to vector<8x256xf32>
    %170 = arith.addf %166, %169 : vector<8x256xf32>
    %171 = arith.maximumf %165, %170 : vector<8x256xf32>
    %172 = vector.extract_strided_slice %4 {offsets = [3, 0, 0], sizes = [1, 16, 8], strides = [1, 1, 1]} : vector<4x16x8xf32> to vector<1x16x8xf32>
    %173 = vector.shape_cast %172 : vector<1x16x8xf32> to vector<16x8xf32>
    %cst_37 = arith.constant dense<0.000000e+00> : vector<16x256xf32>
    %174 = tpu.matmul %173, %171, %cst_37 {dimension_numbers = #tpu.dot_dimension_numbers<[1], [0], [0], [1], [0, 0, 1, 1], [], []>} : vector<16x8xf32>, vector<8x256xf32>, vector<16x256xf32> -> vector<16x256xf32>
    %175 = arith.addf %123, %174 : vector<16x256xf32>
    %176 = vector.broadcast %5 : vector<16x1xf32> to vector<16x256xf32>
    %177 = arith.addf %175, %176 : vector<16x256xf32>
    %178 = arith.negf %177 : vector<16x256xf32>
    %179 = math.exp %178 : vector<16x256xf32>
    %cst_38 = arith.constant 1.000000e+00 : f32
    %180 = vector.broadcast %cst_38 : f32 to vector<16x256xf32>
    %181 = arith.addf %180, %179 : vector<16x256xf32>
    %182 = arith.divf %180, %181 : vector<16x256xf32>
    %183 = arith.mulf %177, %182 : vector<16x256xf32>
    %c0_39 = arith.constant 0 : index
    %c0_40 = arith.constant 0 : index
    %c0_41 = arith.constant 0 : index
    %184 = vector.load %arg8[%c0_39, %c0_40, %c0_41] : memref<1x16x256xf32, #tpu.memory_space<vmem>>, vector<1x16x256xf32>
    %185 = vector.shape_cast %184 : vector<1x16x256xf32> to vector<16x256xf32>
    %186 = vector.shape_cast %183 : vector<16x256xf32> to vector<1x16x256xf32>
    tpu.vector_store %arg8[%c0_39, %c0_40, %c0_41], %186 {strides = array<i32>} : memref<1x16x256xf32, #tpu.memory_space<vmem>>, vector<1x16x256xf32>,
    return
  }
  func.func @transform_0(%arg0: i32) -> (i32, i32, i32) {
    %c0_i32 = arith.constant 0 : i32
    %c0_i32_0 = arith.constant 0 : i32
    %c0_i32_1 = arith.constant 0 : i32
    return %arg0, %c0_i32, %c0_i32_0 : i32, i32, i32
  }
  func.func @transform_1(%arg0: i32) -> (i32, i32) {
    %c0_i32 = arith.constant 0 : i32
    %c0_i32_0 = arith.constant 0 : i32
    %c0_i32_1 = arith.constant 0 : i32
    return %c0_i32, %c0_i32_0 : i32, i32
  }
  func.func @transform_2(%arg0: i32) -> (i32, i32) {
    %c0_i32 = arith.constant 0 : i32
    %c0_i32_0 = arith.constant 0 : i32
    %c0_i32_1 = arith.constant 0 : i32
    return %c0_i32, %c0_i32_0 : i32, i32
  }
  func.func @transform_3(%arg0: i32) -> (i32, i32, i32) {
    %c0_i32 = arith.constant 0 : i32
    %c0_i32_0 = arith.constant 0 : i32
    %c0_i32_1 = arith.constant 0 : i32
    %c0_i32_2 = arith.constant 0 : i32
    return %c0_i32, %c0_i32_0, %c0_i32_1 : i32, i32, i32
  }
  func.func @transform_4(%arg0: i32) -> (i32, i32) {
    %c0_i32 = arith.constant 0 : i32
    %c0_i32_0 = arith.constant 0 : i32
    %c0_i32_1 = arith.constant 0 : i32
    return %c0_i32, %c0_i32_0 : i32, i32
  }
  func.func @transform_5(%arg0: i32) -> (i32, i32, i32) {
    %c0_i32 = arith.constant 0 : i32
    %c0_i32_0 = arith.constant 0 : i32
    %c0_i32_1 = arith.constant 0 : i32
    %c0_i32_2 = arith.constant 0 : i32
    return %c0_i32, %c0_i32_0, %c0_i32_1 : i32, i32, i32
  }
  func.func @transform_6(%arg0: i32) -> (i32, i32, i32) {
    %c0_i32 = arith.constant 0 : i32
    %c0_i32_0 = arith.constant 0 : i32
    %c0_i32_1 = arith.constant 0 : i32
    %c0_i32_2 = arith.constant 0 : i32
    return %c0_i32, %c0_i32_0, %c0_i32_1 : i32, i32, i32
  }
  func.func @transform_7(%arg0: i32) -> (i32, i32, i32) {
    %c0_i32 = arith.constant 0 : i32
    %c0_i32_0 = arith.constant 0 : i32
    %c0_i32_1 = arith.constant 0 : i32
    return %arg0, %c0_i32, %c0_i32_0 : i32, i32, i32
  }
}

</mosaic_0001>

<bundles_post_ra>
// kernel: tpu_custom_call.1
= control target key start
LH: loop header
LB: loop body
LE: loop exit
PB: predicated region body
PF: predicated region fallthrough
CT: control target
= control target key end

     0   :  { %12 = vsyncpa [#allocation3], 0  ;;  %s1751_s0 = inlined_call_operand.vmem [shape: f32[2,16,256], index: 0, kind: input, shape index: {}]   ;;  %s1752_s1 = inlined_call_operand.vmem [shape: f32[8,16], index: 1, kind: input, shape index: {}]   ;;  %s1753_s2 = inlined_call_operand.vmem [shape: f32[8,1], index: 2, kind: input, shape index: {}]   ;;  %s1754_s3 = inlined_call_operand.vmem [shape: f32[4,16,8], index: 3, kind: input, shape index: {}]   ;;  %s1755_s4 = inlined_call_operand.vmem [shape: f32[16,1], index: 4, kind: input, shape index: {}]   ;;  %s1756_s5 = inlined_call_operand.vmem [shape: f32[4,1,256], index: 5, kind: input, shape index: {}]   ;;  %s1757_s6 = inlined_call_operand.vmem [shape: f32[4,1,256], index: 6, kind: input, shape index: {}]   ;;  %s1758_s7 = inlined_call_operand.hbm [shape: f32[2,16,256], index: 7, kind: output, shape index: {}]  }
   0x1   :  { %14 = vsyncpa [#allocation3 + $0x1], 0  ;;  %s1303_s24 = smov 0   ;;  %s1305_s25 = smov 0  }
   0x2   :  { %s1307_s26 = smov 0   ;;  %s1309_s27 = smov 0  }
   0x3 LB: > { %s1324_s28 = sadd.s32 4294967295, %s1251_s27   ;;  %s1073_s29 = sadd.s32 4294967294, %s1251_s27   ;;  %s1251_s27 = sphi %s1309_s27, %s1764_s27   ;;  %s1247_s26 = sphi %s1307_s26, %s1763_s26   ;;  %s1243_s25 = sphi %s1305_s25, %s1762_s25   ;;  %s1239_s24 = sphi %s1303_s24, %s1761_s24  }
   0x4   : > { %s1328_s30 = sadd.s32 1, %s1251_s27   ;;  %s179_s8 = sadd.s32 1, %s1247_s26 }
   0x5   : > { %s176_s9 = ssub.s32 %s1251_s27, %s1328_s30  ;;  %p189_p0 = scmp.ne.s32.totalorder %s1247_s26, %s1243_s25 }
   0x6   : > { %p177_p1 = scmp.eq.s32.totalorder %s176_s9, 0  ;;  %p190_p2 = scmp.eq.s32.totalorder %s1324_s28, 1 }
   0x7   : > { %p195_p3 = scmp.ne.s32.totalorder %s1243_s25, %s1239_s24  ;;  %p196_p4 = scmp.eq.s32.totalorder %s1073_s29, 1 }
   0x8   : > { %s1339_s10 = scalar_select %p177_p1, %s1247_s26, %s179_s8  }
   0x9   : > { %p1341_p5 = por %p190_p2, %p189_p0  ;;  %p1345_p6 = por %p196_p4, %p195_p3 }
   0xa   : > { %p1076_p7 = scmp.ge.s32.totalorder %s1251_s27, 1  ;;  %p240_p8 = scmp.lt.s32.totalorder %s1251_s27, 3 }
   0xc   : > { %p241_p9 = pnand %p1076_p7, %p240_p8 }
   0xd   : > { %p272_p10 = scmp.lt.s32.totalorder (!%p241_p9), %s1324_s28, 1  ;;  %s1254_s22 = smov (!%p241_p9), 2  }
   0xe   : > { %244 = sbr.rel (%p241_p9) target bundleno = 1181 (0x49d), region = 48  ;;  %s1255_s23 = smov (!%p241_p9), 1  }
   0xf   : > { %s1256_s29 = smov (!%p241_p9), 127   ;;  %s1257_s8 = smov (!%p241_p9), 126  }
  0x10   : > { %s1258_s20 = smov (!%p241_p9), 32   ;;  %s1259_s21 = smov (!%p241_p9), 16  }
  0x11   : > { %s1260_s9 = smov (!%p241_p9), 112   ;;  %s1261_s13 = smov (!%p241_p9), 96  }
  0x13   : > { %v282_v0 = vld [vmem:[%s1753_s2] sm:$0xff]  ;;  %v1253_v1 = vmov 0   ;;  %s273_s15 = scalar_select %p272_p10, %s1324_s28, 1  ;;  %vm306_vm0 = vcmask 130048   ;;  %v394_v40 = vlaneseq }
  0x14   : > { %1162 = vset.pattern.permute.xlu0 %v1253_v1  ;;  %1163 = vset.pattern.permute.xlu1 %v1253_v1  ;;  %v281_v6 = vld [vmem:[%s1752_s1] sm:$0xff] }
  0x15   : > { %303 = vperm.xlu0 %1162, %v282_v0   ;;  %1164 = vset.pattern.permute.xlu2 %v1253_v1  ;;  %s1109_s16 = sshll.u32 %s273_s15, 5  ;;  %v1384_v42 = vand.u32 127, %v394_v40  ;;  %v293_v45 = vld [vmem:[%s1756_s5] sm:$0x3]  ;;  %v294_v46 = vld [vmem:[%s1756_s5 + $0x2] sm:$0x3] }
  0x16   : > { %s276_s19 = scalar_lea.vmem %s1751_s0, %s1109_s16  ;;  %v1393_v47 = vperm.slane %v293_v45, 0  ;;  %v1395_v48 = vperm.slane %v293_v45, 1  ;;  %v1402_v52 = vperm.slane %v294_v46, 0  ;;  %v1404_v53 = vperm.slane %v294_v46, 1  ;;  %v295_v59 = vld [vmem:[%s1756_s5 + $0x4] sm:$0x3] }
  0x17   : > { %v279_v2 = vld [vmem:[%s276_s19 + $0x10] sm:$0xff]  ;;  %v280_v3 = vld [vmem:[%s276_s19 + $0x18] sm:$0xff]  ;;  %v277_v4 = vld [vmem:[%s276_s19] sm:$0xff]  ;;  %vm396_vm9 = vcmp.lt.s32.totalorder %v1384_v42, 2  ;;  %vm412_vm10 = vcmp.lt.s32.totalorder %v1384_v42, 1  ;;  %vm428_vm11 = vcmp.lt.s32.totalorder %v1384_v42, 127 }
  0x18   : > { %324 = vmatpush.msra.mxu0 %v279_v2  ;;  %344 = vmatpush.msra.mxu1 %v280_v3  ;;  %v278_v5 = vld [vmem:[%s276_s19 + $0x8] sm:$0xff]  ;;  %v296_v63 = vld [vmem:[%s1756_s5 + $0x6] sm:$0x3]  ;;  %v1423_v2 = vperm.slane %v295_v59, 0  ;;  %v1425_v3 = vperm.slane %v295_v59, 1  ;;  %vm444_vm12 = vcmp.lt.s32.totalorder %v1384_v42, 126 }
  0x19   : > { %vm460_vm13 = vcmp.lt.s32.totalorder %v1384_v42, 32  ;;  %vm476_vm14 = vcmp.lt.s32.totalorder %v1384_v42, 16  ;;  %vm492_vm15 = vcmp.lt.s32.totalorder %v1384_v42, 112  ;;  %v300_v45 = vld [vmem:[%s1757_s6 + $0x6] sm:$0x3]  ;;  %s1110_s19 = sshll.u32 %s1324_s28, 5 }
  0x1a   : > { %325 = vmatpush.msra.mxu0 %v277_v4  ;;  %345 = vmatpush.msra.mxu1 %v278_v5  ;;  %v1496_v59 = vperm.slane %v300_v45, 0  ;;  %s1007_s16 = scalar_lea.hbm %s1758_s7, %s1110_s19 }
  0x1b   : > { %1080 = vmatmul.msk.f32.vlgmr.msra.gmra.mxu0 %vm306_vm0, %v281_v6  ;;  %1081 = vmatmul.msk.f32.vlgmr.msra.gmra.mxu1 %vm306_vm0, %v281_v6  ;;  %vm508_vm0 = vcmp.lt.s32.totalorder %v1384_v42, 96  ;;  %v290_v42 = vld [vmem:[%s1754_s3 + $0x38] sm:$0xff]  ;;  %s1010_s17 = sshll.u32 %s1007_s16, 4  ;;  %s1011_s17 = int_to_ptr.hbm [resolvable:$true] %s1010_s17 }
  0x87   : > { %v304_v7 = vpop.permute.xlu0 %303 }
  0x98   : > { %v327_v8 = vpop.f32.mrf.mxu0  ;;  %v347_v9 = vpop.f32.mrf.mxu1 }
  0x99   : > { %v328_v10 = vadd.f32 %v327_v8, %v304_v7  ;;  %v348_v11 = vadd.f32 %v347_v9, %v304_v7  ;;  %v1432_v8 = vperm.slane %v296_v63, 0  ;;  %v1434_v9 = vperm.slane %v296_v63, 1 }
  0x9b   : > { %v1082_v12 = vmul.f32 -1.442695, %v328_v10  ;;  %v1083_v13 = vmul.f32 -1.442695, %v348_v11 }
  0x9d   : > { %1165 = vpow2.f32 %v1082_v12 }
  0x9e   : > { %1167 = vpow2.f32 %v1083_v13 }
  0xa3   : > { %v1166_v14 = vpop.eup %1165 }
  0xa4   : > { %v1168_v15 = vpop.eup %1167  ;;  %v356_v16 = vadd.f32 1.0, %v1166_v14 }
  0xa5   : > { %v357_v17 = vadd.f32 1.0, %v1168_v15 }
  0xa6   : > { %1169 = vrcp.f32 %v356_v16  ;;  %v369_v23 = vand.u32 2147483648, %v356_v16  ;;  %v367_v26 = vand.u32 2147483647, %v356_v16  ;;  %vm363_vm3 = vweird.f32 %v356_v16 }
  0xa7   : > { %1171 = vrcp.f32 %v357_v17  ;;  %v384_v27 = vand.u32 2147483648, %v357_v17  ;;  %v382_v29 = vand.u32 2147483647, %v357_v17  ;;  %vm378_vm5 = vweird.f32 %v357_v17 }
  0xa8   : > { %v370_v31 = vor.u32 1.1754944e-38, %v369_v23  ;;  %vm368_vm6 = vcmp.eq.f32.partialorder %v367_v26, 8.507059e+37  ;;  %v298_v26 = vld [vmem:[%s1757_s6 + $0x2] sm:$0x3] }
  0xa9   : > { %v385_v34 = vor.u32 1.1754944e-38, %v384_v27  ;;  %vm383_vm8 = vcmp.eq.f32.partialorder %v382_v29, 8.507059e+37 }
  0xac   : > { %v1170_v18 = vpop.eup %1169 }
  0xad   : > { %v1172_v19 = vpop.eup %1171  ;;  %v359_v20 = vmul.f32 %v1170_v18, %v356_v16  ;;  %vm364_vm1 = vweird.f32 %v1170_v18 }
  0xae   : > { %v374_v21 = vmul.f32 %v1172_v19, %v357_v17  ;;  %vm379_vm2 = vweird.f32 %v1172_v19  ;;  %vm365_vm4 = vmor %vm363_vm3, %vm364_vm1  ;;  %vm520_vm1 = vcmask 64512  }
  0xaf   : > { %v360_v22 = vsub.f32 1.0, %v359_v20  ;;  %vm380_vm7 = vmor %vm378_vm5, %vm379_vm2 }
  0xb0   : > { %v375_v24 = vsub.f32 1.0, %v374_v21 }
  0xb1   : > { %v361_v25 = vmul.f32 %v1170_v18, %v360_v22 }
  0xb2   : > { %v376_v28 = vmul.f32 %v1172_v19, %v375_v24  ;;  %v297_v24 = vld [vmem:[%s1757_s6] sm:$0x3] }
  0xb3   : > { %v362_v30 = vadd.f32 %v1170_v18, %v361_v25  ;;  %v1459_v27 = vperm.slane %v297_v24, 0 }
  0xb4   : > { %v377_v32 = vadd.f32 %v1172_v19, %v376_v28  ;;  %v1461_v28 = vperm.slane %v297_v24, 1 }
  0xb5   : > { %v366_v33 = vsel %vm365_vm4, %v1170_v18, %v362_v30 }
  0xb6   : > { %v371_v35 = vsel %vm368_vm6, %v370_v31, %v366_v33  ;;  %v381_v36 = vsel %vm380_vm7, %v1172_v19, %v377_v32  ;;  %v1468_v31 = vperm.slane %v298_v26, 0  ;;  %v1470_v32 = vperm.slane %v298_v26, 1 }
  0xb7   : > { %v1362_v37 = vmul.f32 %v371_v35, %v328_v10  ;;  %v386_v38 = vsel %vm383_vm8, %v385_v34, %v381_v36 }
  0xb8   : > { %v1364_v39 = vmul.f32 %v386_v38, %v348_v11  ;;  %v299_v38 = vld [vmem:[%s1757_s6 + $0x4] sm:$0x3] }
  0xb9   : > { %390 = vrot.lane.b32.xlu0 %v1362_v37, %s1254_s22  ;;  %594 = vmatpush.msrb.mxu0 %v1362_v37 }
  0xba   : > { %410 = vrot.lane.b32.xlu2 %v1364_v39, %s1255_s23  ;;  %392 = vrot.lane.b32.xlu1 %v1364_v39, %s1254_s22 }
  0xbb   : > { %617 = vmatpush.msrb.mxu1 %v1364_v39 }
  0xc1   : > { %426 = vrot.lane.b32.xlu0 %v1364_v39, %s1256_s29 }
  0xc2   : > { %424 = vrot.lane.b32.xlu2 %v1362_v37, %s1256_s29  ;;  %408 = vrot.lane.b32.xlu1 %v1362_v37, %s1255_s23 }
  0xca   : > { %442 = vrot.lane.b32.xlu2 %v1364_v39, %s1257_s8  ;;  %440 = vrot.lane.b32.xlu1 %v1362_v37, %s1257_s8 }
 0x114   : > { %v411_v41 = vpop.permute.xlu2 %410 }
 0x11c   : > { %v425_v51 = vpop.permute.xlu2 %424 }
 0x124   : > { %v443_v10 = vpop.permute.xlu2 %442 }
 0x12b   : > { %v391_v44 = vpop.permute.xlu0 %390 }
 0x12c   : > { %v393_v43 = vpop.permute.xlu1 %392 }
 0x12d   : > { %v397_v49 = vsel %vm396_vm9, %v391_v44, %v393_v43  ;;  %v398_v50 = vsel %vm396_vm9, %v393_v43, %v391_v44 }
 0x12e   : > { %v404_v54 = vadd.f32 %v1393_v47, %v398_v50  ;;  %v405_v55 = vadd.f32 %v1395_v48, %v397_v49 }
 0x130   : > { %v406_v0 = vmax.f32 %v1362_v37, %v404_v54  ;;  %v407_v1 = vmax.f32 %v1364_v39, %v405_v55  ;;  %v1489_v54 = vperm.slane %v299_v38, 1 }
 0x133   : > { %v427_v62 = vpop.permute.xlu0 %426 }
 0x134   : > { %v409_v56 = vpop.permute.xlu1 %408  ;;  %v429_v4 = vsel %vm428_vm11, %v425_v51, %v427_v62  ;;  %v430_v5 = vsel %vm428_vm11, %v427_v62, %v425_v51  ;;  %v1487_v51 = vperm.slane %v299_v38, 0 }
 0x135   : > { %v413_v57 = vsel %vm412_vm10, %v409_v56, %v411_v41  ;;  %v414_v58 = vsel %vm412_vm10, %v411_v41, %v409_v56  ;;  %v436_v11 = vadd.f32 %v1423_v2, %v429_v4  ;;  %v437_v12 = vadd.f32 %v1425_v3, %v430_v5 }
 0x136   : > { %v420_v60 = vadd.f32 %v1402_v52, %v414_v58  ;;  %v421_v61 = vadd.f32 %v1404_v53, %v413_v57 }
 0x138   : > { %v422_v6 = vmax.f32 %v406_v0, %v420_v60  ;;  %v423_v7 = vmax.f32 %v407_v1, %v421_v61  ;;  %v1498_v60 = vperm.slane %v300_v45, 1 }
 0x13a   : > { %v438_v16 = vmax.f32 %v422_v6, %v436_v11  ;;  %v439_v17 = vmax.f32 %v423_v7, %v437_v12 }
 0x13c   : > { %v441_v13 = vpop.permute.xlu1 %440 }
 0x13d   : > { %v445_v14 = vsel %vm444_vm12, %v441_v13, %v443_v10  ;;  %v446_v15 = vsel %vm444_vm12, %v443_v10, %v441_v13 }
 0x13e   : > { %v452_v18 = vadd.f32 %v1432_v8, %v445_v14  ;;  %v453_v19 = vadd.f32 %v1434_v9, %v446_v15 }
 0x140   : > { %v454_v20 = vmax.f32 %v438_v16, %v452_v18  ;;  %v455_v21 = vmax.f32 %v439_v17, %v453_v19 }
 0x142   : > { %458 = vrot.lane.b32.xlu1 %v455_v21, %s1258_s20  ;;  %472 = vrot.lane.b32.xlu2 %v454_v20, %s1259_s21 }
 0x143   : > { %456 = vrot.lane.b32.xlu0 %v454_v20, %s1258_s20 }
 0x14a   : > { %488 = vrot.lane.b32.xlu1 %v454_v20, %s1260_s9  ;;  %490 = vrot.lane.b32.xlu2 %v455_v21, %s1260_s9 }
 0x14b   : > { %474 = vrot.lane.b32.xlu0 %v455_v21, %s1259_s21 }
 0x152   : > { %506 = vrot.lane.b32.xlu1 %v455_v21, %s1261_s13 }
 0x153   : > { %504 = vrot.lane.b32.xlu0 %v454_v20, %s1261_s13 }
 0x19c   : > { %v473_v25 = vpop.permute.xlu2 %472 }
 0x1a4   : > { %v491_v46 = vpop.permute.xlu2 %490 }
 0x1b4   : > { %v459_v22 = vpop.permute.xlu1 %458 }
 0x1b5   : > { %v457_v23 = vpop.permute.xlu0 %456 }
 0x1b6   : > { %v461_v29 = vsel %vm460_vm13, %v457_v23, %v459_v22  ;;  %v462_v30 = vsel %vm460_vm13, %v459_v22, %v457_v23 }
 0x1b7   : > { %v468_v34 = vadd.f32 %v1459_v27, %v462_v30  ;;  %v469_v35 = vadd.f32 %v1461_v28, %v461_v29 }
 0x1b9   : > { %v470_v49 = vmax.f32 %v454_v20, %v468_v34  ;;  %v471_v50 = vmax.f32 %v455_v21, %v469_v35 }
 0x1bc   : > { %v489_v33 = vpop.permute.xlu1 %488 }
 0x1bd   : > { %v475_v36 = vpop.permute.xlu0 %474  ;;  %v493_v55 = vsel %vm492_vm15, %v489_v33, %v491_v46  ;;  %v494_v56 = vsel %vm492_vm15, %v491_v46, %v489_v33 }
 0x1be   : > { %v477_v40 = vsel %vm476_vm14, %v473_v25, %v475_v36  ;;  %v478_v41 = vsel %vm476_vm14, %v475_v36, %v473_v25  ;;  %v500_v62 = vadd.f32 %v1487_v51, %v493_v55  ;;  %v501_v63 = vadd.f32 %v1489_v54, %v494_v56  ;;  %v285_v56 = vld [vmem:[%s1754_s3 + $0x10] sm:$0xff] }
 0x1bf   : > { %v484_v43 = vadd.f32 %v1468_v31, %v478_v41  ;;  %v485_v44 = vadd.f32 %v1470_v32, %v477_v40 }
 0x1c1   : > { %v486_v57 = vmax.f32 %v470_v49, %v484_v43  ;;  %v487_v58 = vmax.f32 %v471_v50, %v485_v44 }
 0x1c3   : > { %v502_v5 = vmax.f32 %v486_v57, %v500_v62  ;;  %v503_v6 = vmax.f32 %v487_v58, %v501_v63 }
 0x1c4   : > { %v507_v61 = vpop.permute.xlu1 %506 }
 0x1c5   : > { %v505_v0 = vpop.permute.xlu0 %504 }
 0x1c6   : > { %v509_v1 = vsel %vm508_vm0, %v505_v0, %v507_v61  ;;  %v510_v4 = vsel %vm508_vm0, %v507_v61, %v505_v0 }
 0x1c7   : > { %v516_v7 = vadd.f32 %v1496_v59, %v509_v1  ;;  %v517_v10 = vadd.f32 %v1498_v60, %v510_v4 }
 0x1c9   : > { %v518_v11 = vmax.f32 %v502_v5, %v516_v7  ;;  %v519_v12 = vmax.f32 %v503_v6, %v517_v10 }
 0x1cb   : > { %627 = vrot.lane.b32.xlu0 %v519_v12, %s1254_s22  ;;  %565 = vmatpush.msra.mxu3 %v519_v12 }
 0x1cc   : > { %635 = vrot.lane.b32.xlu1 %v518_v11, %s1255_s23  ;;  %625 = vrot.lane.b32.xlu2 %v518_v11, %s1254_s22 }
 0x1cd   : > { %542 = vmatpush.msra.mxu2 %v518_v11  ;;  %1112 = vmatpush.msrb.mxu3 %v1364_v39 }
 0x1ce   : > { %1086 = vmatmul.msk.f32.vlgmr.msra.gmra.mxu3 %vm520_vm1, %v285_v56  ;;  %1084 = vmatmul.msk.f32.vlgmr.msra.gmra.mxu2 %vm520_vm1, %v285_v56 }
 0x1cf   : > { %1111 = vmatpush.msrb.mxu2 %v1362_v37 }
 0x1d3   : > { %645 = vrot.lane.b32.xlu0 %v518_v11, %s1256_s29 }
 0x1d4   : > { %647 = vrot.lane.b32.xlu1 %v519_v12, %s1256_s29  ;;  %637 = vrot.lane.b32.xlu2 %v519_v12, %s1255_s23 }
 0x1db   : > { %657 = vrot.lane.b32.xlu0 %v519_v12, %s1257_s8 }
 0x1dc   : > { %655 = vrot.lane.b32.xlu2 %v518_v11, %s1257_s8 }
 0x226   : > { %v626_v13 = vpop.permute.xlu2 %625 }
 0x22e   : > { %v638_v37 = vpop.permute.xlu2 %637 }
 0x236   : > { %v656_v35 = vpop.permute.xlu2 %655 }
 0x23d   : > { %v628_v14 = vpop.permute.xlu0 %627 }
 0x23e   : > { %v636_v15 = vpop.permute.xlu1 %635  ;;  %v629_v16 = vsel %vm396_vm9, %v626_v13, %v628_v14  ;;  %v630_v39 = vsel %vm396_vm9, %v628_v14, %v626_v13 }
 0x23f   : > { %v631_v17 = vadd.f32 %v630_v39, %v1393_v47  ;;  %v632_v18 = vadd.f32 %v629_v16, %v1395_v48  ;;  %v639_v21 = vsel %vm412_vm10, %v636_v15, %v638_v37  ;;  %v640_v22 = vsel %vm412_vm10, %v638_v37, %v636_v15 }
 0x240   : > { %v641_v29 = vadd.f32 %v640_v22, %v1402_v52  ;;  %v642_v30 = vadd.f32 %v639_v21, %v1404_v53 }
 0x241   : > { %v633_v25 = vmax.f32 %v518_v11, %v631_v17  ;;  %v634_v26 = vmax.f32 %v519_v12, %v632_v18 }
 0x243   : > { %v643_v36 = vmax.f32 %v633_v25, %v641_v29  ;;  %v644_v38 = vmax.f32 %v634_v26, %v642_v30 }
 0x245   : > { %v646_v19 = vpop.permute.xlu0 %645 }
 0x246   : > { %v648_v20 = vpop.permute.xlu1 %647 }
 0x247   : > { %v649_v23 = vsel %vm428_vm11, %v646_v19, %v648_v20  ;;  %v650_v24 = vsel %vm428_vm11, %v648_v20, %v646_v19 }
 0x248   : > { %v651_v33 = vadd.f32 %v649_v23, %v1423_v2  ;;  %v652_v34 = vadd.f32 %v650_v24, %v1425_v3 }
 0x24a   : > { %v653_v44 = vmax.f32 %v643_v36, %v651_v33  ;;  %v654_v45 = vmax.f32 %v644_v38, %v652_v34 }
 0x24d   : > { %v658_v40 = vpop.permute.xlu0 %657 }
 0x24e   : > { %v659_v41 = vsel %vm444_vm12, %v656_v35, %v658_v40  ;;  %v660_v43 = vsel %vm444_vm12, %v658_v40, %v656_v35 }
 0x24f   : > { %v661_v46 = vadd.f32 %v659_v41, %v1432_v8  ;;  %v662_v49 = vadd.f32 %v660_v43, %v1434_v9 }
 0x251   : > { %v663_v50 = vmax.f32 %v653_v44, %v661_v46  ;;  %v664_v55 = vmax.f32 %v654_v45, %v662_v49 }
 0x253   : > { %667 = vrot.lane.b32.xlu2 %v664_v55, %s1258_s20  ;;  %675 = vrot.lane.b32.xlu0 %v663_v50, %s1259_s21 }
 0x254   : > { %665 = vrot.lane.b32.xlu1 %v663_v50, %s1258_s20 }
 0x25b   : > { %685 = vrot.lane.b32.xlu2 %v663_v50, %s1260_s9  ;;  %687 = vrot.lane.b32.xlu0 %v664_v55, %s1260_s9 }
 0x25c   : > { %677 = vrot.lane.b32.xlu1 %v664_v55, %s1259_s21 }
 0x263   : > { %697 = vrot.lane.b32.xlu2 %v664_v55, %s1261_s13 }
 0x264   : > { %695 = vrot.lane.b32.xlu1 %v663_v50, %s1261_s13 }
 0x2ad   : > { %v668_v57 = vpop.permute.xlu2 %667 }
 0x2b5   : > { %v686_v0 = vpop.permute.xlu2 %685 }
 0x2bd   : > { %v698_v17 = vpop.permute.xlu2 %697 }
 0x2c5   : > { %v676_v58 = vpop.permute.xlu0 %675 }
 0x2c6   : > { %v666_v61 = vpop.permute.xlu1 %665 }
 0x2c7   : > { %v669_v62 = vsel %vm460_vm13, %v666_v61, %v668_v57  ;;  %v670_v63 = vsel %vm460_vm13, %v668_v57, %v666_v61 }
 0x2c8   : > { %v671_v1 = vadd.f32 %v670_v63, %v1459_v27  ;;  %v672_v4 = vadd.f32 %v669_v62, %v1461_v28 }
 0x2ca   : > { %v673_v13 = vmax.f32 %v663_v50, %v671_v1  ;;  %v674_v14 = vmax.f32 %v664_v55, %v672_v4 }
 0x2cd   : > { %v688_v10 = vpop.permute.xlu0 %687 }
 0x2ce   : > { %v678_v5 = vpop.permute.xlu1 %677  ;;  %v689_v15 = vsel %vm492_vm15, %v686_v0, %v688_v10  ;;  %v690_v16 = vsel %vm492_vm15, %v688_v10, %v686_v0 }
 0x2cf   : > { %v679_v6 = vsel %vm476_vm14, %v676_v58, %v678_v5  ;;  %v680_v7 = vsel %vm476_vm14, %v678_v5, %v676_v58  ;;  %v691_v18 = vadd.f32 %v689_v15, %v1487_v51  ;;  %v692_v19 = vadd.f32 %v690_v16, %v1489_v54  ;;  %v292_v15 = vld [vmem:[%s1755_s4 + $0x8] sm:$0xff] }
 0x2d0   : > { %v681_v11 = vadd.f32 %v680_v7, %v1468_v31  ;;  %v682_v12 = vadd.f32 %v679_v6, %v1470_v32 }
 0x2d2   : > { %v683_v39 = vmax.f32 %v673_v13, %v681_v11  ;;  %v684_v37 = vmax.f32 %v674_v14, %v682_v12  ;;  %v288_v12 = vld [vmem:[%s1754_s3 + $0x28] sm:$0xff]  ;;  %v291_v14 = vld [vmem:[%s1755_s4] sm:$0xff] }
 0x2d4   : > { %v693_v23 = vmax.f32 %v683_v39, %v691_v18  ;;  %v694_v24 = vmax.f32 %v684_v37, %v692_v19 }
 0x2d6   : > { %v696_v20 = vpop.permute.xlu1 %695 }
 0x2d7   : > { %v699_v21 = vsel %vm508_vm0, %v696_v20, %v698_v17  ;;  %v700_v22 = vsel %vm508_vm0, %v698_v17, %v696_v20 }
 0x2d8   : > { %v701_v25 = vadd.f32 %v699_v21, %v1496_v59  ;;  %v702_v26 = vadd.f32 %v700_v22, %v1498_v60 }
 0x2da   : > { %v703_v29 = vmax.f32 %v693_v23, %v701_v25  ;;  %v704_v30 = vmax.f32 %v694_v24, %v702_v26 }
 0x2dc   : > { %763 = vrot.lane.b32.xlu1 %v704_v30, %s1254_s22  ;;  %749 = vmatpush.msra.mxu3 %v704_v30 }
 0x2dd   : > { %771 = vrot.lane.b32.xlu2 %v703_v29, %s1255_s23  ;;  %761 = vrot.lane.b32.xlu0 %v703_v29, %s1254_s22 }
 0x2de   : > { %726 = vmatpush.msra.mxu2 %v703_v29 }
 0x2e4   : > { %781 = vrot.lane.b32.xlu1 %v703_v29, %s1256_s29 }
 0x2e5   : > { %783 = vrot.lane.b32.xlu2 %v704_v30, %s1256_s29  ;;  %773 = vrot.lane.b32.xlu0 %v704_v30, %s1255_s23  ;;  %s1203_s23 = sshra.s32 %s1011_s17, 4  ;;  %s1204_s23 = int_to_ptr.hbm [resolvable:$true] %s1203_s23 }
 0x2e6   : > { %s1205_s29 = scalar_lea.hbm %s1204_s23, 32  ;;  %p1210_p0 = scmp.lt.s32.totalorder %s1204_s23, %s1758_s7 }
 0x2e7   : > { %p1206_p11 = scmp.ne.s32.totalorder %s1204_s23, %s1205_s29 }
 0x2e9   : > { %p1207_p12 = pnand %p1206_p11, %p1341_p5 }
 0x2eb   : > { %p1208_p13 = pneg %p1207_p12 }
 0x2ec   : > { %793 = vrot.lane.b32.xlu1 %v704_v30, %s1257_s8 }
 0x2ed   : > { %791 = vrot.lane.b32.xlu0 %v703_v29, %s1257_s8 }
 0x337   : > { %v772_v35 = vpop.permute.xlu2 %771 }
 0x33f   : > { %v784_v55 = vpop.permute.xlu2 %783 }
 0x34e   : > { %v764_v33 = vpop.permute.xlu1 %763 }
 0x34f   : > { %v762_v34 = vpop.permute.xlu0 %761 }
 0x350   : > { %v765_v36 = vsel %vm396_vm9, %v762_v34, %v764_v33  ;;  %v766_v38 = vsel %vm396_vm9, %v764_v33, %v762_v34 }
 0x351   : > { %v767_v41 = vadd.f32 %v766_v38, %v1393_v47  ;;  %v768_v43 = vadd.f32 %v765_v36, %v1395_v48 }
 0x353   : > { %v769_v56 = vmax.f32 %v703_v29, %v767_v41  ;;  %v770_v57 = vmax.f32 %v704_v30, %v768_v43 }
 0x356   : > { %v782_v40 = vpop.permute.xlu1 %781 }
 0x357   : > { %v774_v44 = vpop.permute.xlu0 %773  ;;  %v785_v58 = vsel %vm428_vm11, %v782_v40, %v784_v55  ;;  %v786_v47 = vsel %vm428_vm11, %v784_v55, %v782_v40 }
 0x358   : > { %v775_v45 = vsel %vm412_vm10, %v772_v35, %v774_v44  ;;  %v776_v46 = vsel %vm412_vm10, %v774_v44, %v772_v35  ;;  %v787_v63 = vadd.f32 %v785_v58, %v1423_v2  ;;  %v788_v0 = vadd.f32 %v786_v47, %v1425_v3  ;;  %v286_v2 = vld [vmem:[%s1754_s3 + $0x18] sm:$0xff]  ;;  %v284_v3 = vld [vmem:[%s1754_s3 + $0x8] sm:$0xff] }
 0x359   : > { %v777_v49 = vadd.f32 %v776_v46, %v1402_v52  ;;  %v778_v50 = vadd.f32 %v775_v45, %v1404_v53  ;;  %1087 = vmatmul.msk.f32.gmra.mxu3 %vm520_vm1, %v286_v2  ;;  %1085 = vmatmul.msk.f32.gmra.mxu2 %vm520_vm1, %v286_v2 }
 0x35b   : > { %v779_v48 = vmax.f32 %v769_v56, %v777_v49  ;;  %v780_v61 = vmax.f32 %v770_v57, %v778_v50 }
 0x35d   : > { %v789_v4 = vmax.f32 %v779_v48, %v787_v63  ;;  %v790_v5 = vmax.f32 %v780_v61, %v788_v0 }
 0x35e   : > { %v794_v62 = vpop.permute.xlu1 %793 }
 0x35f   : > { %v792_v1 = vpop.permute.xlu0 %791 }
 0x360   : > { %v795_v52 = vsel %vm444_vm12, %v792_v1, %v794_v62  ;;  %v796_v53 = vsel %vm444_vm12, %v794_v62, %v792_v1 }
 0x361   : > { %v797_v6 = vadd.f32 %v795_v52, %v1432_v8  ;;  %v798_v7 = vadd.f32 %v796_v53, %v1434_v9  ;;  %1091 = vmatmul.msk.f32.vlgmr.msrb.gmra.mxu3 %vm520_vm1, %v284_v3  ;;  %1089 = vmatmul.msk.f32.vlgmr.msrb.gmra.mxu2 %vm520_vm1, %v284_v3  ;;  %v287_v8 = vld [vmem:[%s1754_s3 + $0x20] sm:$0xff] }
 0x362   : > { %v283_v9 = vld [vmem:[%s1754_s3] sm:$0xff] }
 0x363   : > { %v799_v10 = vmax.f32 %v789_v4, %v797_v6  ;;  %v800_v11 = vmax.f32 %v790_v5, %v798_v7  ;;  %1088 = vmatmul.msk.f32.vlgmr.msrb.gmra.mxu0 %vm520_vm1, %v283_v9  ;;  %1090 = vmatmul.msk.f32.vlgmr.msrb.gmra.mxu1 %vm520_vm1, %v283_v9 }
 0x365   : > { %803 = vrot.lane.b32.xlu0 %v800_v11, %s1258_s20  ;;  %811 = vrot.lane.b32.xlu1 %v799_v10, %s1259_s21 }
 0x366   : > { %801 = vrot.lane.b32.xlu2 %v799_v10, %s1258_s20 }
 0x369   : > { %1094 = vmatmul.msk.f32.vlgmr.msra.gmra.mxu3 %vm520_vm1, %v287_v8  ;;  %1092 = vmatmul.msk.f32.vlgmr.msra.gmra.mxu2 %vm520_vm1, %v287_v8 }
 0x36d   : > { %821 = vrot.lane.b32.xlu0 %v799_v10, %s1260_s9  ;;  %823 = vrot.lane.b32.xlu1 %v800_v11, %s1260_s9  ;;  %s269_s9 = sand.u32 1, %s1243_s25  }
 0x36e   : > { %813 = vrot.lane.b32.xlu2 %v800_v11, %s1259_s21  ;;  %s996_s22 = scalar_lea.sflag [#allocation3], %s269_s9 }
 0x371   : > { %1095 = vmatmul.msk.f32.gmra.mxu3 %vm520_vm1, %v288_v12  ;;  %1093 = vmatmul.msk.f32.gmra.mxu2 %vm520_vm1, %v288_v12 }
 0x375   : > { %833 = vrot.lane.b32.xlu0 %v800_v11, %s1261_s13  ;;  %899 = vperm.xlu1 %1163, %v291_v14  }
 0x376   : > { %831 = vrot.lane.b32.xlu2 %v799_v10, %s1261_s13  ;;  %s1077_s13 = sshll.u32 %s269_s9, 5 }
 0x377   : > { %s1705_s18 = scalar_lea.vmem [#allocation2], %s1077_s13  ;;  %s1209_s13 = scalar_lea.hbm %s1758_s7, 64 }
 0x378   : > { %s1008_s28 = sshll.u32 %s1705_s18, 4  ;;  %p1211_p1 = scmp.lt.s32.totalorder %s1209_s13, %s1205_s29  ;;  %s1009_s28 = int_to_ptr.vmem [resolvable:$true] %s1008_s28 }
 0x37a   : > { %p1212_p2 = por %p1211_p1, %p1210_p0 }
 0x37c   : > { %p1213_p3 = pnand %p1212_p2, %p1208_p13 }
 0x37e   : > { %904 = vperm.xlu2 %1164, %v292_v15  }
 0x3c0   : > { %v802_v13 = vpop.permute.xlu2 %801 }
 0x3c8   : > { %v814_v18 = vpop.permute.xlu2 %813 }
 0x3d0   : > { %v832_v35 = vpop.permute.xlu2 %831 }
 0x3d7   : > { %v804_v16 = vpop.permute.xlu0 %803  ;;  %v812_v39 = vpop.permute.xlu1 %811 }
 0x3d8   : > { %v805_v37 = vsel %vm460_vm13, %v802_v13, %v804_v16  ;;  %v806_v17 = vsel %vm460_vm13, %v804_v16, %v802_v13  ;;  %v815_v23 = vsel %vm476_vm14, %v812_v39, %v814_v18  ;;  %v816_v24 = vsel %vm476_vm14, %v814_v18, %v812_v39  ;;  %v905_v14 = vpop.permute.xlu2 %904 }
 0x3d9   : > { %v807_v19 = vadd.f32 %v806_v17, %v1459_v27  ;;  %v808_v20 = vadd.f32 %v805_v37, %v1461_v28  ;;  %v817_v27 = vadd.f32 %v816_v24, %v1468_v31  ;;  %v818_v28 = vadd.f32 %v815_v23, %v1470_v32 }
 0x3db   : > { %v809_v29 = vmax.f32 %v799_v10, %v807_v19  ;;  %v810_v30 = vmax.f32 %v800_v11, %v808_v20 }
 0x3dd   : > { %v819_v36 = vmax.f32 %v809_v29, %v817_v27  ;;  %v820_v38 = vmax.f32 %v810_v30, %v818_v28 }
 0x3df   : > { %v822_v21 = vpop.permute.xlu0 %821  ;;  %v824_v22 = vpop.permute.xlu1 %823 }
 0x3e0   : > { %v825_v25 = vsel %vm492_vm15, %v822_v21, %v824_v22  ;;  %v826_v26 = vsel %vm492_vm15, %v824_v22, %v822_v21  ;;  %v596_v57 = vpop.f32.mrf.mxu0  ;;  %v619_v58 = vpop.f32.mrf.mxu1 }
 0x3e1   : > { %v827_v33 = vadd.f32 %v825_v25, %v1487_v51  ;;  %v828_v34 = vadd.f32 %v826_v26, %v1489_v54  ;;  %v289_v54 = vld [vmem:[%s1754_s3 + $0x30] sm:$0xff] }
 0x3e3   : > { %v829_v44 = vmax.f32 %v819_v36, %v827_v33  ;;  %v830_v45 = vmax.f32 %v820_v38, %v828_v34 }
 0x3e7   : > { %v834_v40 = vpop.permute.xlu0 %833  ;;  %v900_v1 = vpop.permute.xlu1 %899 }
 0x3e8   : > { %v835_v41 = vsel %vm508_vm0, %v832_v35, %v834_v40  ;;  %v836_v43 = vsel %vm508_vm0, %v834_v40, %v832_v35 }
 0x3e9   : > { %v837_v31 = vadd.f32 %v835_v41, %v1496_v59  ;;  %v838_v32 = vadd.f32 %v836_v43, %v1498_v60  ;;  %v544_v59 = vpop.f32.mrf.mxu2  ;;  %v567_v60 = vpop.f32.mrf.mxu3 }
 0x3ea   : > { %v597_v61 = vadd.f32 %v596_v57, %v544_v59  ;;  %v620_v62 = vadd.f32 %v619_v58, %v567_v60 }
 0x3eb   : > { %v839_v46 = vmax.f32 %v829_v44, %v837_v31  ;;  %v840_v51 = vmax.f32 %v830_v45, %v838_v32 }
 0x3ed   : > { %862 = vmatpush.msra.mxu0 %v839_v46  ;;  %885 = vmatpush.msra.mxu1 %v840_v51 }
 0x3ee   : > { %1096 = vmatmul.msk.f32.vlgmr.msra.gmra.mxu0 %vm520_vm1, %v289_v54  ;;  %1098 = vmatmul.msk.f32.vlgmr.msra.gmra.mxu1 %vm520_vm1, %v289_v54 }
 0x3f1   : > { %v547_v49 = vpop.f32.mrf.mxu2  ;;  %v570_v50 = vpop.f32.mrf.mxu3 }
 0x3f6   : > { %1097 = vmatmul.msk.f32.gmra.mxu0 %vm520_vm1, %v290_v42  ;;  %1099 = vmatmul.msk.f32.gmra.mxu1 %vm520_vm1, %v290_v42 }
 0x3f9   : > { %v599_v55 = vpop.f32.mrf.mxu2  ;;  %v622_v56 = vpop.f32.mrf.mxu3 }
 0x3fa   : > { %v600_v6 = vadd.f32 %v599_v55, %v547_v49  ;;  %v623_v7 = vadd.f32 %v622_v56, %v570_v50 }
 0x401   : > { %v728_v47 = vpop.f32.mrf.mxu2  ;;  %v751_v48 = vpop.f32.mrf.mxu3 }
 0x402   : > { %v757_v63 = vadd.f32 %v728_v47, %v597_v61  ;;  %v758_v0 = vadd.f32 %v751_v48, %v620_v62 }
 0x409   : > { %v731_v2 = vpop.f32.mrf.mxu2  ;;  %v754_v3 = vpop.f32.mrf.mxu3 }
 0x40a   : > { %v759_v12 = vadd.f32 %v731_v2, %v600_v6  ;;  %v760_v13 = vadd.f32 %v754_v3, %v623_v7 }
 0x46b   : > { %v864_v52 = vpop.f32.mrf.mxu0  ;;  %v887_v53 = vpop.f32.mrf.mxu1 }
 0x46c   : > { %v893_v4 = vadd.f32 %v864_v52, %v757_v63  ;;  %v894_v5 = vadd.f32 %v887_v53, %v758_v0 }
 0x46e   : > { %v1684_v10 = vadd.f32 %v900_v1, %v893_v4  ;;  %v1686_v11 = vadd.f32 %v900_v1, %v894_v5 }
 0x470   : > { %v1100_v8 = vmul.f32 -1.442695, %v1684_v10  ;;  %v1101_v9 = vmul.f32 -1.442695, %v1686_v11 }
 0x472   : > { %1173 = vpow2.f32 %v1100_v8 }
 0x473   : > { %1175 = vpow2.f32 %v1101_v9  ;;  %v867_v15 = vpop.f32.mrf.mxu0  ;;  %v890_v16 = vpop.f32.mrf.mxu1 }
 0x474   : > { %v895_v39 = vadd.f32 %v867_v15, %v759_v12  ;;  %v896_v37 = vadd.f32 %v890_v16, %v760_v13 }
 0x476   : > { %v1690_v17 = vadd.f32 %v905_v14, %v895_v39  ;;  %v1692_v18 = vadd.f32 %v905_v14, %v896_v37 }
 0x478   : > { %v1174_v19 = vpop.eup %1173  ;;  %v1102_v20 = vmul.f32 -1.442695, %v1690_v17  ;;  %v1103_v23 = vmul.f32 -1.442695, %v1692_v18 }
 0x479   : > { %v1176_v21 = vpop.eup %1175  ;;  %v923_v22 = vadd.f32 1.0, %v1174_v19 }
 0x47a   : > { %v924_v24 = vadd.f32 1.0, %v1176_v21  ;;  %1177 = vpow2.f32 %v1102_v20 }
 0x47b   : > { %1179 = vrcp.f32 %v923_v22  ;;  %v936_v36 = vand.u32 2147483647, %v923_v22  ;;  %v938_v38 = vand.u32 2147483648, %v923_v22  ;;  %vm932_vm4 = vweird.f32 %v923_v22 }
 0x47c   : > { %1181 = vrcp.f32 %v924_v24  ;;  %v953_v43 = vand.u32 2147483648, %v924_v24  ;;  %v951_v45 = vand.u32 2147483647, %v924_v24  ;;  %vm947_vm6 = vweird.f32 %v924_v24 }
 0x47d   : > { %1183 = vpow2.f32 %v1103_v23  ;;  %v939_v46 = vor.u32 1.1754944e-38, %v938_v38  ;;  %vm937_vm7 = vcmp.eq.f32.partialorder %v936_v36, 8.507059e+37 }
 0x47e   : > { %v954_v42 = vor.u32 1.1754944e-38, %v953_v43  ;;  %vm952_vm9 = vcmp.eq.f32.partialorder %v951_v45, 8.507059e+37 }
 0x480   : > { %v1178_v25 = vpop.eup %1177 }
 0x481   : > { %v1180_v26 = vpop.eup %1179  ;;  %v925_v29 = vadd.f32 1.0, %v1178_v25 }
 0x482   : > { %v1182_v30 = vpop.eup %1181  ;;  %v928_v27 = vmul.f32 %v1180_v26, %v923_v22  ;;  %vm933_vm2 = vweird.f32 %v1180_v26 }
 0x483   : > { %v1184_v28 = vpop.eup %1183  ;;  %v943_v33 = vmul.f32 %v1182_v30, %v924_v24  ;;  %1185 = vrcp.f32 %v925_v29  ;;  %vm948_vm3 = vweird.f32 %v1182_v30  ;;  %vm934_vm5 = vmor %vm932_vm4, %vm933_vm2  ;;  %v968_v47 = vand.u32 2147483648, %v925_v29 }
 0x484   : > { %v929_v34 = vsub.f32 1.0, %v928_v27  ;;  %v1696_v35 = vadd.f32 1.0, %v1184_v28  ;;  %vm949_vm8 = vmor %vm947_vm6, %vm948_vm3  ;;  %v966_v62 = vand.u32 2147483647, %v925_v29  ;;  %vm962_vm11 = vweird.f32 %v925_v29 }
 0x485   : > { %v944_v40 = vsub.f32 1.0, %v943_v33  ;;  %v969_v52 = vor.u32 1.1754944e-38, %v968_v47 }
 0x486   : > { %v930_v41 = vmul.f32 %v1180_v26, %v929_v34  ;;  %1187 = vrcp.f32 %v1696_v35  ;;  %v983_v1 = vand.u32 2147483648, %v1696_v35  ;;  %v981_v4 = vand.u32 2147483647, %v1696_v35 }
 0x487   : > { %v945_v44 = vmul.f32 %v1182_v30, %v944_v40  ;;  %vm967_vm14 = vcmp.eq.f32.partialorder %v966_v62, 8.507059e+37  ;;  %vm977_vm15 = vweird.f32 %v1696_v35 }
 0x488   : > { %v931_v31 = vadd.f32 %v1180_v26, %v930_v41  ;;  %vm982_vm1 = vcmp.eq.f32.partialorder %v981_v4, 8.507059e+37 }
 0x489   : > { %v1186_v32 = vpop.eup %1185  ;;  %v946_v51 = vadd.f32 %v1182_v30, %v945_v44 }
 0x48a   : > { %v935_v54 = vsel %vm934_vm5, %v1180_v26, %v931_v31  ;;  %v958_v59 = vmul.f32 %v1186_v32, %v925_v29  ;;  %vm963_vm10 = vweird.f32 %v1186_v32 }
 0x48b   : > { %v940_v60 = vsel %vm937_vm7, %v939_v46, %v935_v54  ;;  %v950_v49 = vsel %vm949_vm8, %v1182_v30, %v946_v51  ;;  %vm964_vm12 = vmor %vm962_vm11, %vm963_vm10 }
 0x48c   : > { %v1188_v50 = vpop.eup %1187  ;;  %v955_v55 = vsel %vm952_vm9, %v954_v42, %v950_v49  ;;  %v987_v56 = vmul.f32 %v940_v60, %v1684_v10  ;;  %v959_v57 = vsub.f32 1.0, %v958_v59  ;;  %v984_v10 = vor.u32 1.1754944e-38, %v983_v1 }
 0x48d   : > { %v988_v58 = vmul.f32 %v955_v55, %v1686_v11  ;;  %v973_v48 = vmul.f32 %v1188_v50, %v1696_v35  ;;  %vm978_vm13 = vweird.f32 %v1188_v50 }
 0x48e   : > { %991 = vst [vmem:[%s1705_s18] sm:$0xff] %v987_v56  ;;  %v960_v61 = vmul.f32 %v1186_v32, %v959_v57  ;;  %vm979_vm0 = vmor %vm977_vm15, %vm978_vm13 }
 0x48f   : > { %992 = vst [vmem:[%s1705_s18 + $0x8] sm:$0xff] %v988_v58  ;;  %v974_v63 = vsub.f32 1.0, %v973_v48 }
 0x490   : > { %v961_v0 = vadd.f32 %v1186_v32, %v960_v61 }
 0x491   : > { %v975_v53 = vmul.f32 %v1188_v50, %v974_v63 }
 0x492   : > { %v965_v5 = vsel %vm964_vm12, %v1186_v32, %v961_v0 }
 0x493   : > { %v970_v6 = vsel %vm967_vm14, %v969_v52, %v965_v5  ;;  %v976_v7 = vadd.f32 %v1188_v50, %v975_v53 }
 0x494   : > { %v989_v11 = vmul.f32 %v970_v6, %v1690_v17 }
 0x495   : > { %v980_v2 = vsel %vm979_vm0, %v1188_v50, %v976_v7 }
 0x496   : > { %v985_v3 = vsel %vm982_vm1, %v984_v10, %v980_v2  ;;  %993 = vst [vmem:[%s1705_s18 + $0x10] sm:$0xff] %v989_v11 }
 0x497   : > { %v990_v8 = vmul.f32 %v985_v3, %v1692_v18 }
 0x499   : > { %994 = vst [vmem:[%s1705_s18 + $0x18] sm:$0xff] %v990_v8 }
 0x49a   : > { %1216 = shalt.err (!%p1213_p3)
}
 0x49b   : > { %s1262_s9 = smov 256  }
 0x49c   : > { %1113 = dma.vmem_to_hbm [thread:$0]  (%p1341_p5), %s1009_s28, 512, %s1011_s17, %s996_s22, %s1262_s9, %s1262_s9, %s1259_s21  }
 0x49d PF: > { %p1119_p4 = scmp.ge.s32.totalorder %s1251_s27, 2  ;;  %s1025_s18 = sand.u32 1, %s1239_s24  }
 0x49e   : > { %s1026_s15 = scalar_lea.sflag [#allocation3], %s1025_s18 }
 0x49f   : > { %p1116_p7 = pnand %p1119_p4, %p1345_p6 }
 0x4a1   : > { %p1117_p8 = pneg %p1116_p7 }
 0x4a3   : > { %1234 = dma.done.wait (%p1117_p8), %s1026_s15, 512  }
 0x4a4   : > { %1236 = vsyncadd (%p1117_p8), %s1026_s15, 4294966784  ;;  %p17_p9 = scmp.ge.s32.totalorder %s1328_s30, 4   ;;  %s1761_s24 = smov %s1243_s25 }
 0x4a5   : > { %s1762_s25 = smov %s1247_s26  ;;  %s1763_s26 = smov %s1339_s10 }
 0x4a6   : > { %s1764_s27 = smov %s1328_s30  ;;  %19 = sbr.rel (!%p17_p9) target bundleno = 3 (0x3), region = 83 }
 0x4ab   :  { %1032 = vsyncpa [#allocation3], 1 }
 0x4ac   :  { %1034 = vsyncpa [#allocation3 + $0x1], 1 }

</bundles_post_ra>
